<compile_context>
chip_gen: v5e
topology: v5e:2x2
jax: 0.10.0
libtpu: 0.0.40
codegen_flags: <defaults>
</compile_context>

<pallas_src>
import functools

import jax
import jax.numpy as jnp
from jax.experimental import pallas as pl
from jax.experimental.pallas import tpu as pltpu


# ---------------------------------------------------------------------------
# Helpers.
# ---------------------------------------------------------------------------
def _vmem_limit_bytes():
    """Generation-aware scoped-VMEM limit (~75% of physical VMEM)."""
    try:
        cap = pltpu.get_tpu_info().vmem_capacity_bytes
        return int(min(0.75 * cap, 100 * 1024 * 1024))
    except Exception:
        # Safe everywhere: v7x has 64 MiB physical, v5e/v6e have 128 MiB.
        return 48 * 1024 * 1024


def _dim_tile(extent, unit, cap):
    """Fixed tile along one dim: a multiple of `unit` <= cap, or the full
    extent when the whole dim already fits under the cap (always legal)."""
    if extent <= cap:
        return extent
    return max(unit, (cap // unit) * unit)


def _pick_tiles(rows, cols, itemsize, target_block_bytes=2 * 1024 * 1024):
    """Byte-budgeted (row, col) tiles for the streaming (B*C, HW) passes."""
    # Lane (last-dim) tile: 2048 elems for f32, 4096 for bf16, ... (cap 8 KiB/row).
    col_cap = max(128, (8192 // itemsize // 128) * 128)
    col_tile = _dim_tile(cols, 128, col_cap)
    # Sublane (row) tile: fill ~target_block_bytes per block.
    row_cap = max(8, (target_block_bytes // (col_tile * itemsize) // 8) * 8)
    row_tile = _dim_tile(rows, 8, row_cap)
    return row_tile, col_tile


# ---------------------------------------------------------------------------
# Fused single-pass kernel: pool + excitation + rescale on a resident slab.
# ---------------------------------------------------------------------------
def _fused_se_kernel(x_ref, w1_ref, b1_ref, w2_ref, b2_ref, o_ref, *, inv_hw):
    # x_ref/o_ref: (1, C, HW); w1_ref: (C, Cm); b1_ref: (1, Cm);
    # w2_ref: (Cm, C); b2_ref: (1, C).  All weights use constant index maps.
    pooled = jnp.sum(x_ref[...], axis=-1, dtype=jnp.float32) * inv_hw   # (1, C)
    h = jnp.dot(pooled, w1_ref[...],
                preferred_element_type=jnp.float32) + b1_ref[...]       # (1, Cm)
    h = jnp.maximum(h, 0.0)
    z = jnp.dot(h, w2_ref[...],
                preferred_element_type=jnp.float32) + b2_ref[...]       # (1, C)
    s = jax.nn.sigmoid(z)                                               # (1, C)
    # (1, C) -> (C, 1): tiny in-vreg transpose so the per-channel scale
    # broadcasts along the HW (lane) axis of the resident slab.
    s_col = jnp.transpose(s).astype(o_ref.dtype)                        # (C, 1)
    o_ref[0] = x_ref[0] * s_col


# ---------------------------------------------------------------------------
# Streaming fallback, pass 1: per-(b, c) partial sums over the HW axis.
# ---------------------------------------------------------------------------
def _pool_kernel(x_ref, psum_ref, acc_ref, *, hw, hw_tile):
    # x_ref: (row_tile, hw_tile); psum_ref/acc_ref: (row_tile, 1) f32
    k = pl.program_id(1)

    @pl.when(k == 0)
    def _():
        acc_ref[...] = jnp.zeros_like(acc_ref)

    x = x_ref[...]
    if hw % hw_tile != 0:
        # Ragged last HW tile: zero out-of-bounds columns before summing
        # (padded input data is undefined).
        valid = hw - k * hw_tile
        col = jax.lax.broadcasted_iota(jnp.int32, x.shape, 1)
        x = jnp.where(col < valid, x, jnp.zeros_like(x))
    acc_ref[...] += jnp.sum(x, axis=-1, keepdims=True, dtype=jnp.float32)

    @pl.when(k == pl.num_programs(1) - 1)
    def _():
        psum_ref[...] = acc_ref[...]


# ---------------------------------------------------------------------------
# Streaming fallback, pass 2: rescale each (b, c) row of the activation.
# ---------------------------------------------------------------------------
def _rescale_kernel(x_ref, s_ref, o_ref):
    # x_ref/o_ref: (row_tile, hw_tile); s_ref: (row_tile, 1) f32
    o_ref[...] = x_ref[...] * s_ref[...].astype(o_ref.dtype)


def se_block(x_nchw, w1, b1, w2, b2, *, force_two_pass=False):
    """SEBlock forward: x * sigmoid(W2 relu(W1 avgpool(x) + b1) + b2).

    Args:
      x_nchw: (B, C, H, W) input (PyTorch NCHW convention).
      w1: (Cm, C, 1, 1) first 1x1 conv weight; b1: (Cm,) bias.
      w2: (C, Cm, 1, 1) second 1x1 conv weight; b2: (C,) bias.
      force_two_pass: force the streaming fallback (used for testing).
    """
    B, C, H, W = x_nchw.shape
    Cm = w1.shape[0]
    HW = H * W
    R = B * C
    dtype = x_nchw.dtype
    itemsize = jnp.dtype(dtype).itemsize
    inv_hw = float(1.0 / HW)

    w1t = w1.reshape(Cm, C).T.astype(jnp.float32)      # (C, Cm)
    w2t = w2.reshape(C, Cm).T.astype(jnp.float32)      # (Cm, C)
    b1r = b1.reshape(1, Cm).astype(jnp.float32)
    b2r = b2.reshape(1, C).astype(jnp.float32)

    vmem_limit = _vmem_limit_bytes()

    # ---------------- Fused single pass: read x once, write once -------------
    # VMEM use: double-buffered input + output slabs (~4x slab) + temporaries.
    slab_bytes = C * HW * itemsize
    fused_fits = 5 * slab_bytes + (2 * 1024 * 1024) <= vmem_limit

    if fused_fits and not force_two_pass:
        # NOTE(v7x): with B == 1 the single "parallel" batch axis leaves one of
        # the two TensorCores idle; the ~1.5x HBM-traffic win from fusing still
        # dominates for typical SE slabs.
        x3 = x_nchw.reshape(B, C, HW)
        try:
            out3 = pl.pallas_call(
                functools.partial(_fused_se_kernel, inv_hw=inv_hw),
                out_shape=jax.ShapeDtypeStruct((B, C, HW), dtype),
                grid=(B,),
                in_specs=[
                    pl.BlockSpec((1, C, HW), lambda b: (b, 0, 0)),
                    pl.BlockSpec((C, Cm), lambda b: (0, 0)),
                    pl.BlockSpec((1, Cm), lambda b: (0, 0)),
                    pl.BlockSpec((Cm, C), lambda b: (0, 0)),
                    pl.BlockSpec((1, C), lambda b: (0, 0)),
                ],
                out_specs=pl.BlockSpec((1, C, HW), lambda b: (b, 0, 0)),
                compiler_params=pltpu.CompilerParams(
                    dimension_semantics=("parallel",),
                    vmem_limit_bytes=vmem_limit),
            )(x3, w1t, b1r, w2t, b2r)
            return out3.reshape(B, C, H, W)
        except Exception:
            # Defensive: if the fused variant fails to lower on some TPU
            # generation, fall through to the streaming two-pass path.
            pass

    # ---------------- Streaming two-pass fallback (large slabs) --------------
    x2 = x_nchw.reshape(R, HW)                 # lane-dense (B*C, HW) view
    row_tile, hw_tile = _pick_tiles(R, HW, itemsize)
    grid = (pl.cdiv(R, row_tile), pl.cdiv(HW, hw_tile))

    # Pass 1: per-(b, c) partial sums, reduction (HW) axis last / "arbitrary".
    psum = pl.pallas_call(
        functools.partial(_pool_kernel, hw=HW, hw_tile=hw_tile),
        out_shape=jax.ShapeDtypeStruct((R, 1), jnp.float32),
        grid=grid,
        in_specs=[pl.BlockSpec((row_tile, hw_tile), lambda i, k: (i, k))],
        out_specs=pl.BlockSpec((row_tile, 1), lambda i, k: (i, 0)),
        scratch_shapes=[pltpu.VMEM((row_tile, 1), jnp.float32)],
        compiler_params=pltpu.CompilerParams(
            dimension_semantics=("parallel", "arbitrary"),
            vmem_limit_bytes=vmem_limit),
    )(x2)

    # Tiny excitation MLP on the (B, C) pooled means in plain JAX: better MXU
    # shape than per-batch (1, C) matmuls and 4 fewer kernel operands.
    pooled = psum.reshape(B, C) * inv_hw
    h = jnp.maximum(pooled @ w1t + b1r, 0.0)
    s = jax.nn.sigmoid(h @ w2t + b2r)                       # (B, C) f32
    s2 = s.reshape(R, 1)

    # Pass 2: lane-dense rescale; both axes "parallel" (megacore on v7x).
    out2 = pl.pallas_call(
        _rescale_kernel,
        out_shape=jax.ShapeDtypeStruct((R, HW), dtype),
        grid=grid,
        in_specs=[
            pl.BlockSpec((row_tile, hw_tile), lambda i, j: (i, j)),
            pl.BlockSpec((row_tile, 1), lambda i, j: (i, 0)),
        ],
        out_specs=pl.BlockSpec((row_tile, hw_tile), lambda i, j: (i, j)),
        compiler_params=pltpu.CompilerParams(
            dimension_semantics=("parallel", "parallel"),
            vmem_limit_bytes=vmem_limit),
    )(x2, s2)
    return out2.reshape(B, C, H, W)


def _reference(x, w1, b1, w2, b2):
    """Pure-JAX reference matching the PyTorch forward."""
    B, C, H, W = x.shape
    Cm = w1.shape[0]
    pooled = jnp.mean(x.astype(jnp.float32), axis=(2, 3))          # (B, C)
    h = jnp.maximum(pooled @ w1.reshape(Cm, C).T + b1, 0.0)
    s = jax.nn.sigmoid(h @ w2.reshape(C, Cm).T + b2)               # (B, C)
    return (x * s[:, :, None, None].astype(x.dtype)).astype(x.dtype)


if __name__ == "__main__":
    # Module config: in_channels=4, bottleneck_ratio=2 -> mid channels = 2
    B, C, H, W = 2, 4, 16, 16
    ratio = 2
    Cm = int(C / ratio)

    key = jax.random.PRNGKey(0)
    kx, k1, kb1, k2, kb2 = jax.random.split(key, 5)

    x = jax.random.normal(kx, (B, C, H, W), dtype=jnp.float32)
    # Deterministic synthetic parameters (Conv2d 1x1 weight/bias shapes).
    w1 = 0.3 * jax.random.normal(k1, (Cm, C, 1, 1), dtype=jnp.float32)
    b1 = 0.1 * jax.random.normal(kb1, (Cm,), dtype=jnp.float32)
    w2 = 0.3 * jax.random.normal(k2, (C, Cm, 1, 1), dtype=jnp.float32)
    b2 = 0.1 * jax.random.normal(kb2, (C,), dtype=jnp.float32)

    ref = _reference(x, w1, b1, w2, b2)

    # Default path (fused single pass for slabs this small).
    out_fused = se_block(x, w1, b1, w2, b2)
    jax.block_until_ready(out_fused)
    assert out_fused.shape == (B, C, H, W)
    assert jnp.allclose(out_fused, ref, atol=1e-5, rtol=1e-5), "fused mismatch"

    # Also exercise the streaming two-pass fallback used for oversized slabs.
    out_2p = se_block(x, w1, b1, w2, b2, force_two_pass=True)
    jax.block_until_ready(out_2p)
    assert jnp.allclose(out_2p, ref, atol=1e-5, rtol=1e-5), "two-pass mismatch"

    print("KERNEL_OK")
</pallas_src>

<mosaic_0001>
module attributes {stable_mosaic.version = 11 : i64} {
  func.func @_fused_se_kernel(%arg0: i32, %arg1: memref<1x4x256xf32, #tpu.memory_space<vmem>>, %arg2: memref<4x2xf32, #tpu.memory_space<vmem>>, %arg3: memref<1x2xf32, #tpu.memory_space<vmem>>, %arg4: memref<2x4xf32, #tpu.memory_space<vmem>>, %arg5: memref<1x4xf32, #tpu.memory_space<vmem>>, %arg6: memref<1x4x256xf32, #tpu.memory_space<vmem>>) attributes {dimension_semantics = [#tpu.dimension_semantics<parallel>], iteration_bounds = array<i64: 2>, scalar_prefetch = 0 : i64, scratch_operands = 0 : i64, tpu.core_type = #tpu.core_type<tc>, window_params = [{transform_indices = @transform_0, window_bounds = array<i64: 1, 4, 256>}, {pipeline_mode = #tpu.pipeline_mode<synchronous>, transform_indices = @transform_1, window_bounds = array<i64: 4, 2>}, {pipeline_mode = #tpu.pipeline_mode<synchronous>, transform_indices = @transform_2, window_bounds = array<i64: 1, 2>}, {pipeline_mode = #tpu.pipeline_mode<synchronous>, transform_indices = @transform_3, window_bounds = array<i64: 2, 4>}, {pipeline_mode = #tpu.pipeline_mode<synchronous>, transform_indices = @transform_4, window_bounds = array<i64: 1, 4>}, {transform_indices = @transform_5, window_bounds = array<i64: 1, 4, 256>}]} {
    %c0 = arith.constant 0 : index
    %c0_0 = arith.constant 0 : index
    %c0_1 = arith.constant 0 : index
    %0 = vector.load %arg1[%c0, %c0_0, %c0_1] : memref<1x4x256xf32, #tpu.memory_space<vmem>>, vector<1x4x256xf32>
    %cst = arith.constant dense<0.000000e+00> : vector<1x4xf32>
    %1 = vector.multi_reduction <add>, %0, %cst [2] : vector<1x4x256xf32> to vector<1x4xf32>
    %cst_2 = arith.constant 3.906250e-03 : f32
    %2 = vector.broadcast %cst_2 : f32 to vector<1x4xf32>
    %3 = arith.mulf %1, %2 : vector<1x4xf32>
    %c0_3 = arith.constant 0 : index
    %c0_4 = arith.constant 0 : index
    %4 = vector.load %arg2[%c0_3, %c0_4] : memref<4x2xf32, #tpu.memory_space<vmem>>, vector<4x2xf32>
    %cst_5 = arith.constant dense<0.000000e+00> : vector<1x2xf32>
    %5 = tpu.matmul %3, %4, %cst_5 {dimension_numbers = #tpu.dot_dimension_numbers<[1], [0], [0], [1], [0, 0, 1, 1], [], []>} : vector<1x4xf32>, vector<4x2xf32>, vector<1x2xf32> -> vector<1x2xf32>
    %c0_6 = arith.constant 0 : index
    %c0_7 = arith.constant 0 : index
    %6 = vector.load %arg3[%c0_6, %c0_7] : memref<1x2xf32, #tpu.memory_space<vmem>>, vector<1x2xf32>
    %7 = arith.addf %5, %6 : vector<1x2xf32>
    %cst_8 = arith.constant 0.000000e+00 : f32
    %8 = vector.broadcast %cst_8 : f32 to vector<1x2xf32>
    %9 = arith.maximumf %7, %8 : vector<1x2xf32>
    %c0_9 = arith.constant 0 : index
    %c0_10 = arith.constant 0 : index
    %10 = vector.load %arg4[%c0_9, %c0_10] : memref<2x4xf32, #tpu.memory_space<vmem>>, vector<2x4xf32>
    %cst_11 = arith.constant dense<0.000000e+00> : vector<1x4xf32>
    %11 = tpu.matmul %9, %10, %cst_11 {dimension_numbers = #tpu.dot_dimension_numbers<[1], [0], [0], [1], [0, 0, 1, 1], [], []>} : vector<1x2xf32>, vector<2x4xf32>, vector<1x4xf32> -> vector<1x4xf32>
    %c0_12 = arith.constant 0 : index
    %c0_13 = arith.constant 0 : index
    %12 = vector.load %arg5[%c0_12, %c0_13] : memref<1x4xf32, #tpu.memory_space<vmem>>, vector<1x4xf32>
    %13 = arith.addf %11, %12 : vector<1x4xf32>
    %14 = arith.negf %13 : vector<1x4xf32>
    %15 = math.exp %14 : vector<1x4xf32>
    %cst_14 = arith.constant 1.000000e+00 : f32
    %16 = vector.broadcast %cst_14 : f32 to vector<1x4xf32>
    %17 = arith.addf %16, %15 : vector<1x4xf32>
    %18 = arith.divf %16, %17 : vector<1x4xf32>
    %19 = tpu.transpose %18, [1, 0] : vector<1x4xf32> -> vector<4x1xf32>
    %c0_15 = arith.constant 0 : index
    %c0_16 = arith.constant 0 : index
    %c0_17 = arith.constant 0 : index
    %20 = vector.load %arg1[%c0_15, %c0_16, %c0_17] : memref<1x4x256xf32, #tpu.memory_space<vmem>>, vector<1x4x256xf32>
    %21 = vector.shape_cast %20 : vector<1x4x256xf32> to vector<4x256xf32>
    %22 = vector.broadcast %19 : vector<4x1xf32> to vector<4x256xf32>
    %23 = arith.mulf %21, %22 : vector<4x256xf32>
    %c0_18 = arith.constant 0 : index
    %c0_19 = arith.constant 0 : index
    %c0_20 = arith.constant 0 : index
    %24 = vector.load %arg6[%c0_18, %c0_19, %c0_20] : memref<1x4x256xf32, #tpu.memory_space<vmem>>, vector<1x4x256xf32>
    %25 = vector.shape_cast %24 : vector<1x4x256xf32> to vector<4x256xf32>
    %26 = vector.shape_cast %23 : vector<4x256xf32> to vector<1x4x256xf32>
    tpu.vector_store %arg6[%c0_18, %c0_19, %c0_20], %26 {strides = array<i32>} : memref<1x4x256xf32, #tpu.memory_space<vmem>>, vector<1x4x256xf32>,
    return
  }
  func.func @transform_0(%arg0: i32) -> (i32, i32, i32) {
    %c0_i32 = arith.constant 0 : i32
    %c0_i32_0 = arith.constant 0 : i32
    %c0_i32_1 = arith.constant 0 : i32
    return %arg0, %c0_i32, %c0_i32_0 : i32, i32, i32
  }
  func.func @transform_1(%arg0: i32) -> (i32, i32) {
    %c0_i32 = arith.constant 0 : i32
    %c0_i32_0 = arith.constant 0 : i32
    %c0_i32_1 = arith.constant 0 : i32
    return %c0_i32, %c0_i32_0 : i32, i32
  }
  func.func @transform_2(%arg0: i32) -> (i32, i32) {
    %c0_i32 = arith.constant 0 : i32
    %c0_i32_0 = arith.constant 0 : i32
    %c0_i32_1 = arith.constant 0 : i32
    return %c0_i32, %c0_i32_0 : i32, i32
  }
  func.func @transform_3(%arg0: i32) -> (i32, i32) {
    %c0_i32 = arith.constant 0 : i32
    %c0_i32_0 = arith.constant 0 : i32
    %c0_i32_1 = arith.constant 0 : i32
    return %c0_i32, %c0_i32_0 : i32, i32
  }
  func.func @transform_4(%arg0: i32) -> (i32, i32) {
    %c0_i32 = arith.constant 0 : i32
    %c0_i32_0 = arith.constant 0 : i32
    %c0_i32_1 = arith.constant 0 : i32
    return %c0_i32, %c0_i32_0 : i32, i32
  }
  func.func @transform_5(%arg0: i32) -> (i32, i32, i32) {
    %c0_i32 = arith.constant 0 : i32
    %c0_i32_0 = arith.constant 0 : i32
    %c0_i32_1 = arith.constant 0 : i32
    return %arg0, %c0_i32, %c0_i32_0 : i32, i32, i32
  }
}

module attributes {stable_mosaic.version = 11 : i64} {
  func.func @_pool_kernel(%arg0: i32, %arg1: i32, %arg2: memref<8x256xf32, #tpu.memory_space<vmem>>, %arg3: memref<8x1xf32, #tpu.memory_space<vmem>>, %arg4: memref<8x1xf32, #tpu.memory_space<vmem>>) attributes {dimension_semantics = [#tpu.dimension_semantics<parallel>, #tpu.dimension_semantics<arbitrary>], iteration_bounds = array<i64: 1, 1>, scalar_prefetch = 0 : i64, scratch_operands = 1 : i64, tpu.core_type = #tpu.core_type<tc>, window_params = [{transform_indices = @transform_0, window_bounds = array<i64: 8, 256>}, {transform_indices = @transform_1, window_bounds = array<i64: 8, 1>}]} {
    %c0_i32 = arith.constant 0 : i32
    %0 = arith.cmpi eq, %arg1, %c0_i32 : i32
    %1 = arith.extui %0 : i1 to i32
    %c0_i32_0 = arith.constant 0 : i32
    %2 = arith.cmpi ne, %1, %c0_i32_0 : i32
    scf.if %2 {
      %cst_8 = arith.constant 0.000000e+00 : f32
      %12 = vector.broadcast %cst_8 : f32 to vector<8x1xf32>
      %c0_9 = arith.constant 0 : index
      %c0_10 = arith.constant 0 : index
      %13 = vector.load %arg4[%c0_9, %c0_10] : memref<8x1xf32, #tpu.memory_space<vmem>>, vector<8x1xf32>
      tpu.vector_store %arg4[%c0_9, %c0_10], %12 {strides = array<i32>} : memref<8x1xf32, #tpu.memory_space<vmem>>, vector<8x1xf32>,
    } else {
    }
    %c0 = arith.constant 0 : index
    %c0_1 = arith.constant 0 : index
    %3 = vector.load %arg2[%c0, %c0_1] : memref<8x256xf32, #tpu.memory_space<vmem>>, vector<8x256xf32>
    %c0_2 = arith.constant 0 : index
    %c0_3 = arith.constant 0 : index
    %4 = vector.load %arg4[%c0_2, %c0_3] : memref<8x1xf32, #tpu.memory_space<vmem>>, vector<8x1xf32>
    %cst = arith.constant dense<0.000000e+00> : vector<8xf32>
    %5 = vector.multi_reduction <add>, %3, %cst [1] : vector<8x256xf32> to vector<8xf32>
    %6 = vector.shape_cast %5 : vector<8xf32> to vector<8x1xf32>
    %7 = arith.addf %4, %6 : vector<8x1xf32>
    %c0_4 = arith.constant 0 : index
    %c0_5 = arith.constant 0 : index
    %8 = vector.load %arg4[%c0_4, %c0_5] : memref<8x1xf32, #tpu.memory_space<vmem>>, vector<8x1xf32>
    tpu.vector_store %arg4[%c0_4, %c0_5], %7 {strides = array<i32>} : memref<8x1xf32, #tpu.memory_space<vmem>>, vector<8x1xf32>,
    %c0_i32_6 = arith.constant 0 : i32
    %9 = arith.cmpi eq, %arg1, %c0_i32_6 : i32
    %10 = arith.extui %9 : i1 to i32
    %c0_i32_7 = arith.constant 0 : i32
    %11 = arith.cmpi ne, %10, %c0_i32_7 : i32
    scf.if %11 {
      %c0_8 = arith.constant 0 : index
      %c0_9 = arith.constant 0 : index
      %12 = vector.load %arg4[%c0_8, %c0_9] : memref<8x1xf32, #tpu.memory_space<vmem>>, vector<8x1xf32>
      %c0_10 = arith.constant 0 : index
      %c0_11 = arith.constant 0 : index
      %13 = vector.load %arg3[%c0_10, %c0_11] : memref<8x1xf32, #tpu.memory_space<vmem>>, vector<8x1xf32>
      tpu.vector_store %arg3[%c0_10, %c0_11], %12 {strides = array<i32>} : memref<8x1xf32, #tpu.memory_space<vmem>>, vector<8x1xf32>,
    } else {
    }
    return
  }
  func.func @transform_0(%arg0: i32, %arg1: i32) -> (i32, i32) {
    %c0_i32 = arith.constant 0 : i32
    return %arg0, %arg1 : i32, i32
  }
  func.func @transform_1(%arg0: i32, %arg1: i32) -> (i32, i32) {
    %c0_i32 = arith.constant 0 : i32
    %c0_i32_0 = arith.constant 0 : i32
    return %arg0, %c0_i32 : i32, i32
  }
}

</mosaic_0001>

<bundles_post_ra>
// kernel: tpu_custom_call.1
= control target key start
LH: loop header
LB: loop body
LE: loop exit
PB: predicated region body
PF: predicated region fallthrough
CT: control target
= control target key end

     0   :  { %10 = vsyncpa [#allocation3], 0  ;;  %s822_s0 = inlined_call_operand.hbm [shape: f32[2,4,256], index: 0, kind: input, shape index: {}]   ;;  %s823_s1 = inlined_call_operand.vmem [shape: f32[4,2], index: 1, kind: input, shape index: {}]   ;;  %s824_s2 = inlined_call_operand.vmem [shape: f32[1,2], index: 2, kind: input, shape index: {}]   ;;  %s825_s3 = inlined_call_operand.vmem [shape: f32[2,4], index: 3, kind: input, shape index: {}]   ;;  %s826_s4 = inlined_call_operand.vmem [shape: f32[1,4], index: 4, kind: input, shape index: {}]   ;;  %s827_s5 = inlined_call_operand.hbm [shape: f32[2,4,256], index: 5, kind: output, shape index: {}]  }
   0x1   :  { %12 = vsyncpa [#allocation3 + $0x1], 0 }
   0x2   :  { %13 = vsyncpa [#allocation4], 0 }
   0x3   :  { %15 = vsyncpa [#allocation4 + $0x1], 0  ;;  %s675_s18 = smov 0   ;;  %s677_s19 = smov 0  }
   0x4   :  { %s679_s20 = smov 0   ;;  %s681_s21 = smov 0  }
   0x5 LB: > { %s696_s22 = sadd.s32 4294967295, %s641_s21   ;;  %s469_s23 = sadd.s32 4294967294, %s641_s21   ;;  %s641_s21 = sphi %s681_s21, %s837_s21   ;;  %s637_s20 = sphi %s679_s20, %s836_s20   ;;  %s633_s19 = sphi %s677_s19, %s835_s19   ;;  %s629_s18 = sphi %s675_s18, %s834_s18  }
   0x6   : > { %s700_s24 = sadd.s32 1, %s641_s21   ;;  %s28_s25 = sadd.s32 1, %s637_s20 }
   0x7   : > { %s25_s26 = ssub.s32 %s641_s21, %s700_s24  ;;  %p35_p0 = scmp.ne.s32.totalorder %s637_s20, %s633_s19 }
   0x8   : > { %p26_p1 = scmp.eq.s32.totalorder %s25_s26, 0  ;;  %p36_p2 = scmp.eq.s32.totalorder %s641_s21, 0 }
   0x9   : > { %p41_p3 = scmp.ne.s32.totalorder %s633_s19, %s629_s18  ;;  %p42_p4 = scmp.eq.s32.totalorder %s696_s22, 0 }
   0xa   : > { %s712_s27 = scalar_select %p26_p1, %s637_s20, %s28_s25  }
   0xb   : > { %p714_p5 = por %p36_p2, %p35_p0  ;;  %p718_p6 = por %p42_p4, %p41_p3 }
   0xc   : > { %p149_p7 = scmp.eq.s32.totalorder %s696_s22, 1  ;;  %p155_p8 = scmp.eq.s32.totalorder %s469_s23, 1 }
   0xd   : > { %p502_p10 = scmp.lt.s32.totalorder %s641_s21, 2  ;;  %s187_s7 = sand.u32 1, %s637_s20  }
   0xe   : > { %p725_p11 = por %p149_p7, %p35_p0  ;;  %p729_p12 = por %p155_p8, %p41_p3 }
   0xf   : > { %s488_s8 = sshll.u32 %s641_s21, 3  ;;  %s472_s9 = sshll.u32 %s187_s7, 3 }
  0x10   : > { %s196_s12 = scalar_lea.hbm %s822_s0, %s488_s8  ;;  %s191_s14 = scalar_lea.vmem [#allocation2], %s472_s9 }
  0x11   : > { %s198_s13 = sshll.u32 %s196_s12, 4  ;;  %s200_s15 = sshll.u32 %s191_s14, 4  ;;  %s199_s13 = int_to_ptr.hbm [resolvable:$true] %s198_s13  ;;  %s201_s15 = int_to_ptr.vmem [resolvable:$true] %s200_s15 }
  0x12   : > { %p740_p13 = pnand %p502_p10, %p714_p5  ;;  %p475_p0 = scmp.ge.s32.totalorder %s641_s21, 1 }
  0x13   : > { %p205_p1 = scmp.lt.s32.totalorder %s641_s21, 3  ;;  %s188_s17 = scalar_lea.sflag [#allocation3], %s187_s7 }
  0x14   : > { %s545_s23 = sshra.s32 %s199_s13, 4  ;;  %p549_p3 = pneg %p740_p13  ;;  %s546_s23 = int_to_ptr.hbm [resolvable:$true] %s545_s23 }
  0x15   : > { %s547_s25 = scalar_lea.hbm %s546_s23, 8  ;;  %s552_s28 = scalar_lea.hbm %s822_s0, 16 }
  0x16   : > { %p548_p2 = scmp.ne.s32.totalorder %s546_s23, %s547_s25  ;;  %p553_p5 = scmp.lt.s32.totalorder %s546_s23, %s822_s0 }
  0x17   : > { %p554_p8 = scmp.lt.s32.totalorder %s552_s28, %s547_s25 }
  0x18   : > { %p550_p4 = pnand %p549_p3, %p548_p2 }
  0x19   : > { %p555_p10 = por %p554_p8, %p553_p5 }
  0x1a   : > { %p551_p7 = pneg %p550_p4 }
  0x1c   : > { %p556_p9 = pnand %p555_p10, %p551_p7 }
  0x1e   : > { %559 = shalt.err (!%p556_p9)
}
  0x1f   : > { %497 = dma.hbm_to_vmem [thread:$0]  (!%p740_p13), %s199_s13, 128, %s201_s15, %s188_s17  }
  0x20   : > { %p206_p2 = pnand %p475_p0, %p205_p1 }
  0x21   : > { %s761_s7 = sand.u32 (!%p206_p2), 1, %s633_s19  }
  0x22   : > { %209 = sbr.rel (%p206_p2) target bundleno = 745 (0x2e9), region = 40  ;;  %s476_s11 = sshll.u32 (!%p206_p2), %s761_s7, 3 }
  0x23   : > { %s212_s12 = scalar_lea.sflag (!%p206_p2), [#allocation3], %s761_s7  ;;  %s215_s14 = scalar_lea.vmem (!%p206_p2), [#allocation2], %s476_s11 }
  0x27   : > { %620 = dma.done.wait (%p718_p6), %s212_s12, 128  }
  0x28   : > { %622 = vsyncadd (%p718_p6), %s212_s12, 4294967168  ;;  %v771_v0 = vld [vmem:[%s215_s14] sm:$0xff]  ;;  %vm250_vm0 = vcmask 1043456   ;;  %v257_v6 = vld [vmem:[%s823_s1] sm:$0xf]  ;;  %v260_v7 = vlaneseq  ;;  %vm263_vm1 = vcmask 31744  }
  0x29   : > { %245 = vst [vmem:[#allocation1] ss:$2 sm:$0xff] %v771_v0  ;;  %478 = vmatpush.msk.msra.mxu0 %vm250_vm0, %v257_v6  ;;  %v290_v12 = vld [vmem:[%s825_s3] sm:$0x3]  ;;  %vm296_vm2 = vcmask 1041408   ;;  %vm292_vm3 = vcmask 15360  }
  0x2a   : > { %v261_v8 = vand.u32 127, %v260_v7  ;;  %480 = vmatpush.msk.msra.mxu1 %vm296_vm2, %v290_v12  ;;  %v258_v13 = vld [vmem:[%s824_s2] sm:$0x1]  ;;  %v643_v19 = vmov 0   ;;  %v644_v35 = vmov 839922192  }
  0x2b   : > { %v291_v17 = vld [vmem:[%s826_s4] sm:$0x1]  ;;  %539 = vset.pattern.permute.xlu1 %v643_v19  ;;  %v376_v36 = vunpack.c.l.s4 %v644_v35  ;;  %s489_s8 = sshll.u32 %s696_s22, 3  ;;  %s242_s12 = scalar_lea.vmem [#allocation5], %s476_s11 }
  0x2c   : > { %s394_s10 = scalar_lea.hbm %s827_s5, %s489_s8  ;;  %s396_s14 = sshll.u32 %s242_s12, 4  ;;  %s397_s14 = int_to_ptr.vmem [resolvable:$true] %s396_s14 }
  0x2d   : > { %v377_v37 = vunpack.c.0.s8 %v376_v36  ;;  %s398_s13 = sshll.u32 %s394_s10, 4  ;;  %s383_s15 = scalar_lea.sflag [#allocation4], %s761_s7  ;;  %s399_s13 = int_to_ptr.hbm [resolvable:$true] %s398_s13 }
  0x2e   : > { %s589_s29 = sshra.s32 %s399_s13, 4  ;;  %s595_s11 = scalar_lea.hbm %s827_s5, 16  ;;  %s590_s29 = int_to_ptr.hbm [resolvable:$true] %s589_s29 }
  0x2f   : > { %s591_s22 = scalar_lea.hbm %s590_s29, 8  ;;  %p596_p0 = scmp.lt.s32.totalorder %s590_s29, %s827_s5 }
  0x30   : > { %v246_v1 = vld.sshfl [vmem:[#allocation1] sm:$0xff pattern:$0x75316420]  ;;  %v247_v2 = vld.sshfl [vmem:[#allocation1 + $0x8] sm:$0xff pattern:$0x75316420]  ;;  %p592_p6 = scmp.ne.s32.totalorder %s590_s29, %s591_s22  ;;  %p597_p1 = scmp.lt.s32.totalorder %s595_s11, %s591_s22 }
  0x31   : > { %v251_v3 = vsel %vm250_vm0, %v246_v1, 0.0  ;;  %v252_v4 = vsel %vm250_vm0, %v247_v2, 0.0 }
  0x32   : > { %v253_v5 = vadd.f32 %v252_v4, %v251_v3  ;;  %p593_p9 = pnand %p592_p6, %p725_p11  ;;  %p598_p3 = por %p597_p1, %p596_p0 }
  0x34   : > { %254 = vadd.xlane.f32.xlu0 %v253_v5  ;;  %p594_p13 = pneg %p593_p9 }
  0x36   : > { %p599_p4 = pnand %p598_p3, %p594_p13 }
  0xa7   : > { %v255_v9 = vpop.xlane.xlu0 %254 }
  0xa8   : > { %v256_v10 = vmul.f32 0.00390625, %v255_v9 }
  0xaa   : > { %v262_v11 = vperm.slane %v256_v10, %v261_v8 }
  0xac   : > { %479 = vmatmul.msk.f32.vlgmr.msra.gmra.mxu0 %vm263_vm1, %v262_v11 }
 0x129   : > { %v286_v14 = vpop.f32.mrf.mxu0 }
 0x12a   : > { %v287_v15 = vadd.f32 %v286_v14, %v258_v13 }
 0x12c   : > { %v289_v16 = vmax.f32 %v287_v15, 0.0 }
 0x12e   : > { %481 = vmatmul.msk.f32.vlgmr.msra.gmra.mxu1 %vm292_vm3, %v289_v16 }
 0x1ab   : > { %v317_v18 = vpop.f32.mrf.mxu1 }
 0x1ac   : > { %v318_v20 = vadd.f32 %v317_v18, %v291_v17 }
 0x1ae   : > { %v482_v21 = vmul.f32 -1.442695, %v318_v20 }
 0x1b0   : > { %541 = vpow2.f32 %v482_v21 }
 0x1b6   : > { %v542_v22 = vpop.eup %541 }
 0x1b7   : > { %v323_v23 = vadd.f32 1.0, %v542_v22 }
 0x1b9   : > { %543 = vrcp.f32 %v323_v23  ;;  %v335_v27 = vand.u32 2147483648, %v323_v23  ;;  %v333_v29 = vand.u32 2147483647, %v323_v23  ;;  %vm329_vm5 = vweird.f32 %v323_v23 }
 0x1bb   : > { %v336_v31 = vor.u32 1.1754944e-38, %v335_v27  ;;  %vm334_vm7 = vcmp.eq.f32.partialorder %v333_v29, 8.507059e+37 }
 0x1bf   : > { %v544_v24 = vpop.eup %543 }
 0x1c0   : > { %v325_v25 = vmul.f32 %v544_v24, %v323_v23  ;;  %vm330_vm4 = vweird.f32 %v544_v24 }
 0x1c1   : > { %vm331_vm6 = vmor %vm329_vm5, %vm330_vm4 }
 0x1c2   : > { %v326_v26 = vsub.f32 1.0, %v325_v25 }
 0x1c4   : > { %v327_v28 = vmul.f32 %v544_v24, %v326_v26 }
 0x1c6   : > { %v328_v30 = vadd.f32 %v544_v24, %v327_v28 }
 0x1c8   : > { %v332_v32 = vsel %vm331_vm6, %v544_v24, %v328_v30 }
 0x1c9   : > { %v337_v33 = vsel %vm334_vm7, %v336_v31, %v332_v32 }
 0x1ca   : > { %339 = vxpose.xlu0.b32.start.end [1/1] (short) (narrow) %v337_v33, 8 }
 0x231   : > { %540 = vset.pattern.permute.xlu0 %v643_v19 }
 0x26e   : > { %v355_v34 = vpop.trf.xlu0 }
 0x26f   : > { %373 = vperm.xlu1 %539, %v355_v34  }
 0x2e1   : > { %v374_v38 = vpop.permute.xlu1 %373 }
 0x2e2   : > { %v378_v39 = vperm.slane %v374_v38, %v377_v37 }
 0x2e4   : > { %v380_v40 = vmul.f32 %v378_v39, %v771_v0 }
 0x2e6   : > { %381 = vst [vmem:[%s242_s12] sm:$0xff] %v380_v40 }
 0x2e7   : > { %602 = shalt.err (!%p599_p4)
}
 0x2e8   : > { %492 = dma.vmem_to_hbm [thread:$0]  (%p725_p11), %s397_s14, 128, %s399_s13, %s383_s15  }
 0x2e9 PF: > { %s410_s7 = sand.u32 1, %s629_s18   ;;  %p833_p7 = scmp.ge.s32.totalorder %s641_s21, 2 }
 0x2ea   : > { %s411_s26 = scalar_lea.sflag [#allocation4], %s410_s7 }
 0x2eb   : > { %p499_p5 = pnand %p833_p7, %p729_p12 }
 0x2ed   : > { %p500_p8 = pneg %p499_p5 }
 0x2ef   : > { %624 = dma.done.wait (%p500_p8), %s411_s26, 128  }
 0x2f0   : > { %626 = vsyncadd (%p500_p8), %s411_s26, 4294967168  ;;  %p18_p10 = scmp.ge.s32.totalorder %s700_s24, 4   ;;  %s834_s18 = smov %s633_s19 }
 0x2f1   : > { %s835_s19 = smov %s637_s20  ;;  %s836_s20 = smov %s712_s27 }
 0x2f2   : > { %s837_s21 = smov %s700_s24  ;;  %20 = sbr.rel (!%p18_p10) target bundleno = 5 (0x5), region = 85 }
 0x2f7   :  { %417 = vsyncpa [#allocation3], 1 }
 0x2f8   :  { %419 = vsyncpa [#allocation3 + $0x1], 1 }
 0x2f9   :  { %420 = vsyncpa [#allocation4], 1 }
 0x2fa   :  { %422 = vsyncpa [#allocation4 + $0x1], 1 }

// kernel: tpu_custom_call.1
= control target key start
LH: loop header
LB: loop body
LE: loop exit
PB: predicated region body
PF: predicated region fallthrough
CT: control target
= control target key end

     0   :  { %6 = vsyncpa [#allocation4], 0  ;;  %s75_s9 = smov [#allocation3]   ;;  %s93_s0 = inlined_call_operand.hbm [shape: f32[8,256], index: 0, kind: input, shape index: {}]   ;;  %s94_s1 = inlined_call_operand.vmem [shape: f32[8,1], index: 1, kind: output, shape index: {}]  }
   0x1   :  { %s12_s8 = sshll.u32 %s93_s0, 4  ;;  %s14_s10 = sshll.u32 %s75_s9, 4  ;;  %s13_s8 = int_to_ptr.hbm [resolvable:$true] %s12_s8  ;;  %s15_s10 = int_to_ptr.vmem [resolvable:$true] %s14_s10 }
   0x2   :  { %17 = dma.hbm_to_vmem [thread:$0]  %s13_s8, 256, %s15_s10, [#allocation4]  }
   0x3   :  { %73 = dma.done.wait [#allocation4], 256  }
   0x4   :  { %74 = vsyncadd [#allocation4], 4294967040  ;;  %vm26_vm0 = vcmask 7168   ;;  %v76_v0 = vmov 0.0   ;;  %v28_v1 = vld [vmem:[#allocation3] sm:$0xff]  ;;  %v29_v2 = vld [vmem:[#allocation3 + $0x8] sm:$0xff] }
   0x5   :  { %27 = vst.msk [vmem:[#allocation2] sm:$0xff] %vm26_vm0, %v76_v0  ;;  %v31_v3 = vadd.f32 %v29_v2, %v28_v1 }
   0x7   :  { %32 = vadd.xlane.f32.xlu0 %v31_v3 }
   0xc   :  { %v30_v4 = vld [vmem:[#allocation2] sm:$0xff] }
  0x7a   :  { %v33_v5 = vpop.xlane.xlu0 %32 }
  0x7b   :  { %v34_v6 = vadd.f32 %v33_v5, %v30_v4 }
  0x7d   :  { %36 = vst.msk [vmem:[#allocation2] sm:$0xff] %vm26_vm0, %v34_v6 }
  0x84   :  { %v40_v7 = vld [vmem:[#allocation2] sm:$0xff] }
  0x85   :  { %41 = vst.msk [vmem:[%s94_s1] sm:$0xff] %vm26_vm0, %v40_v7 }
  0x86   :  { %46 = vsyncpa [#allocation4], 1 }

</bundles_post_ra>
